<compile_context>
chip_gen: v5e
topology: v5e:2x2
jax: 0.10.0
libtpu: 0.0.40
codegen_flags: <defaults>
</compile_context>

<pallas_src>
import functools
import math

import jax
import jax.numpy as jnp
from jax.experimental import pallas as pl
from jax.experimental.pallas import tpu as pltpu

_LANE = 128              # full vreg lane width -> unmasked vst
_SUBLANE_PACK = 32       # (32,128) covers the packed tile for u8/i8 and all wider dtypes
_MAX_TILE_ROWS = 8192    # u8 in 1 MiB + f32 out 4 MiB per buffer; ~10 MiB double-buffered
_MIN_GRID_STEPS = 4      # >=2 steps per TC on v7x megacore -> pipelining on both cores


def _round_up(x: int, m: int) -> int:
    return ((x + m - 1) // m) * m


def _convert_kernel(x_ref, o_ref, *, max_val, out_dtype):
    # Elementwise: cast to target dtype; for int sources divide by the source
    # dtype's max value.  Division (not mul-by-reciprocal) matches torchvision
    # `image.to(dtype) / max` bit-for-bit.  float->float is a bare cast.
    x = x_ref[...].astype(out_dtype)
    if max_val is not None:
        x = x / jnp.asarray(max_val, dtype=out_dtype)
    o_ref[...] = x


def convert_image_dtype(image: jax.Array, dtype=jnp.float32) -> jax.Array:
    """JAX/Pallas equivalent of torchvision's F.convert_image_dtype.

    Supports: integer -> float (scale by 1/max), float -> float (pure cast).
    """
    out_dtype = jnp.dtype(dtype)
    in_dtype = image.dtype

    if not jnp.issubdtype(out_dtype, jnp.floating):
        # TODO(synk): float->int / int->int torchvision paths (eps/overflow) not implemented.
        raise NotImplementedError("Only conversion to floating dtypes is implemented.")

    if in_dtype == out_dtype:
        return image

    max_val = None
    if not jnp.issubdtype(in_dtype, jnp.floating):
        max_val = float(jnp.iinfo(in_dtype).max)

    orig_shape = image.shape
    total = math.prod(orig_shape) if orig_shape else 1
    if total == 0:
        return image.astype(out_dtype)

    # Lane-dense 2-D view: (rows, 128).  Only pad to a whole number of
    # 128-lane rows (usually a no-op); the ragged last grid block is masked
    # by Pallas, so no padding to a tile multiple and no output slice needed
    # in the common case.
    rows = pl.cdiv(total, _LANE)
    padded_total = rows * _LANE

    flat = image.reshape(-1)
    if padded_total != total:
        flat = jnp.pad(flat, (0, padded_total - total))
    x2d = flat.reshape(rows, _LANE)

    if rows <= _SUBLANE_PACK:
        # Single block equal to the full array dims: always a legal tile shape,
        # even when rows is below the packed-dtype minimum of 32.
        tile_rows = rows
    else:
        tile_rows = min(
            _MAX_TILE_ROWS,
            max(_SUBLANE_PACK,
                _round_up(pl.cdiv(rows, _MIN_GRID_STEPS), _SUBLANE_PACK)),
        )
    grid_rows = pl.cdiv(rows, tile_rows)

    kernel = functools.partial(_convert_kernel, max_val=max_val, out_dtype=out_dtype)

    out2d = pl.pallas_call(
        kernel,
        out_shape=jax.ShapeDtypeStruct((rows, _LANE), out_dtype),
        grid=(grid_rows,),
        in_specs=[pl.BlockSpec((tile_rows, _LANE), lambda i: (i, 0))],
        out_specs=pl.BlockSpec((tile_rows, _LANE), lambda i: (i, 0)),
        compiler_params=pltpu.CompilerParams(
            dimension_semantics=("parallel",),
            # Explicit limit: required on v5e (16 MiB scoped default), safe on
            # v7x (64 MiB physical per TC); our footprint is ~10 MiB max.
            vmem_limit_bytes=48 * 1024 * 1024,
        ),
    )(x2d)

    out = out2d.reshape(-1)
    if padded_total != total:
        out = out[:total]
    return out.reshape(orig_shape)


class ConvertImageDtype:
    """Mirror of the PyTorch module: forward(image, target) -> (image, target)."""

    def __init__(self, dtype=jnp.float32):
        self.dtype = dtype

    def __call__(self, image, target=None):
        return convert_image_dtype(image, self.dtype), target


if __name__ == "__main__":
    key = jax.random.PRNGKey(0)
    # NCHW uint8 image, small shape.
    x_u8 = jax.random.randint(key, (2, 4, 16, 16), minval=0, maxval=256, dtype=jnp.int32)
    x_u8 = x_u8.astype(jnp.uint8)

    module = ConvertImageDtype(jnp.float32)
    out, tgt = module(x_u8, target=None)
    out = jax.block_until_ready(out)

    # Reference check: uint8 -> float32 is x / 255 (exact match, divide kept in-kernel).
    ref = x_u8.astype(jnp.float32) / 255.0
    assert out.shape == (2, 4, 16, 16)
    assert out.dtype == jnp.float32
    assert jnp.max(jnp.abs(out - ref)) == 0.0
    assert tgt is None

    print("KERNEL_OK")
</pallas_src>

<mosaic_0001>
module attributes {stable_mosaic.version = 11 : i64} {
  func.func @_convert_kernel(%arg0: i32, %arg1: memref<16x128xi8, #tpu.memory_space<vmem>>, %arg2: memref<16x128xf32, #tpu.memory_space<vmem>>) attributes {dimension_semantics = [#tpu.dimension_semantics<parallel>], iteration_bounds = array<i64: 1>, scalar_prefetch = 0 : i64, scratch_operands = 0 : i64, tpu.core_type = #tpu.core_type<tc>, window_params = [{transform_indices = @transform_0, window_bounds = array<i64: 16, 128>}, {transform_indices = @transform_1, window_bounds = array<i64: 16, 128>}]} {
    %c0 = arith.constant 0 : index
    %c0_0 = arith.constant 0 : index
    %0 = vector.load %arg1[%c0, %c0_0] : memref<16x128xi8, #tpu.memory_space<vmem>>, vector<16x128xi8>
    %1 = arith.uitofp %0 : vector<16x128xi8> to vector<16x128xf32>
    %cst = arith.constant 2.550000e+02 : f32
    %2 = vector.broadcast %cst : f32 to vector<16x128xf32>
    %3 = arith.divf %1, %2 : vector<16x128xf32>
    %c0_1 = arith.constant 0 : index
    %c0_2 = arith.constant 0 : index
    %4 = vector.load %arg2[%c0_1, %c0_2] : memref<16x128xf32, #tpu.memory_space<vmem>>, vector<16x128xf32>
    tpu.vector_store %arg2[%c0_1, %c0_2], %3 {strides = array<i32>} : memref<16x128xf32, #tpu.memory_space<vmem>>, vector<16x128xf32>,
    return
  }
  func.func @transform_0(%arg0: i32) -> (i32, i32) {
    %c0_i32 = arith.constant 0 : i32
    %c0_i32_0 = arith.constant 0 : i32
    return %arg0, %c0_i32 : i32, i32
  }
  func.func @transform_1(%arg0: i32) -> (i32, i32) {
    %c0_i32 = arith.constant 0 : i32
    %c0_i32_0 = arith.constant 0 : i32
    return %arg0, %c0_i32 : i32, i32
  }
}

</mosaic_0001>

<bundles_post_ra>
// kernel: tpu_custom_call.1
= control target key start
LH: loop header
LB: loop body
LE: loop exit
PB: predicated region body
PF: predicated region fallthrough
CT: control target
= control target key end

     0   :  { %6 = vsyncpa [#allocation3], 0  ;;  %s151_s0 = inlined_call_operand.hbm [shape: u8[16,128], index: 0, kind: input, shape index: {}]   ;;  %s152_s1 = inlined_call_operand.hbm [shape: f32[16,128], index: 1, kind: output, shape index: {}]  }
   0x1   :  { %7 = vsyncpa [#allocation4], 0  ;;  %s12_s8 = sshll.u32 %s151_s0, 4  ;;  %s128_s9 = smov [#allocation2]   ;;  %s13_s8 = int_to_ptr.hbm [resolvable:$true] %s12_s8 }
   0x2   :  { %s14_s10 = sshll.u32 %s128_s9, 4  ;;  %s129_s11 = smov 32   ;;  %s15_s10 = int_to_ptr.vmem [resolvable:$true] %s14_s10 }
   0x3   :  { %s130_s12 = smov 2  }
   0x4   :  { %20 = dma.hbm_to_vmem [thread:$0]  %s13_s8, 64, %s15_s10, [#allocation3], %s129_s11, %s129_s11, %s130_s12  }
   0x5   :  { %124 = dma.done.wait [#allocation3], 64  }
   0x6   :  { %125 = vsyncadd [#allocation3], 4294967232  ;;  %v131_v0 = vmov 255.0   ;;  %v64_v2 = vld [vmem:[#allocation2] sm:$0xf]   ;;  %s132_s0 = smov [#allocation5]  }
   0x7   :  { %74 = vrcp.f32 %v131_v0  ;;  %v65_v3 = vunpack.c.0.s8 %v64_v2  ;;  %v66_v5 = vunpack.c.1.s8 %v64_v2  ;;  %s48_s13 = sshll.u32 %s132_s0, 4  ;;  %s50_s16 = sshll.u32 %s152_s1, 4  ;;  %s49_s13 = int_to_ptr.vmem [resolvable:$true] %s48_s13  ;;  %s51_s16 = int_to_ptr.hbm [resolvable:$true] %s50_s16 }
   0x8   :  { %s133_s17 = smov 128   ;;  %s134_s18 = smov 8  }
   0x9   :  { %v29_v6 = vand.u32 255, %v65_v3  ;;  %v30_v8 = vand.u32 255, %v66_v5 }
   0xb   :  { %v31_v10 = vcvt.s32.f32 %v29_v6  ;;  %v32_v11 = vcvt.s32.f32 %v30_v8 }
   0xd   :  { %v75_v1 = vpop.eup %74 }
   0xe   :  { %v34_v4 = vmul.f32 255.0, %v75_v1  ;;  %vm38_vm0 = vweird.f32 %v75_v1 }
  0x10   :  { %v35_v7 = vsub.f32 1.0, %v34_v4 }
  0x12   :  { %v36_v9 = vmul.f32 %v75_v1, %v35_v7 }
  0x14   :  { %v37_v12 = vadd.f32 %v75_v1, %v36_v9 }
  0x16   :  { %v39_v13 = vsel %vm38_vm0, %v75_v1, %v37_v12 }
  0x17   :  { %v40_v14 = vmul.f32 %v39_v13, %v31_v10  ;;  %v41_v15 = vmul.f32 %v39_v13, %v32_v11 }
  0x19   :  { %42 = vst [vmem:[#allocation5] sm:$0xff] %v40_v14 }
  0x1a   :  { %43 = vst [vmem:[#allocation5 + $0x8] sm:$0xff] %v41_v15 }
  0x1b   :  { %56 = dma.vmem_to_hbm [thread:$0]  %s49_s13, 256, %s51_s16, [#allocation4], %s133_s17, %s133_s17, %s134_s18  }
  0x1c   :  { %126 = dma.done.wait [#allocation4], 256  }
  0x1d   :  { %127 = vsyncadd [#allocation4], 4294967040 }
  0x1e   :  { %61 = vsyncpa [#allocation3], 1 }
  0x1f   :  { %62 = vsyncpa [#allocation4], 1 }

</bundles_post_ra>
